<compile_context>
chip_gen: v7x
topology: tpu7x:2x2x1
jax: 0.10.0
libtpu: 0.0.40
codegen_flags: <defaults>
</compile_context>

<pallas_src>
import functools

import jax
import jax.numpy as jnp
from jax.experimental import pallas as pl
from jax.experimental.pallas import tpu as pltpu

_INV_SQRT2 = 0.7071067811865476
_SQRT_2_OVER_PI = 0.7978845608028654


def _layernorm(v, gamma, beta, eps=1e-5):
    # v: (rows, E); gamma/beta: (1, E). Biased variance, like torch.nn.LayerNorm.
    mu = jnp.mean(v, axis=-1, keepdims=True)
    var = jnp.mean((v - mu) ** 2, axis=-1, keepdims=True)
    return (v - mu) * jax.lax.rsqrt(var + eps) * gamma + beta


def _gelu_exact(v):
    # torch.nn.GELU() default (exact erf form).
    return 0.5 * v * (1.0 + jax.lax.erf(v * _INV_SQRT2))


def _gelu_tanh(v):
    # tanh approximation (EUP-side transcendental instead of a long VPU poly).
    return 0.5 * v * (1.0 + jnp.tanh(_SQRT_2_OVER_PI * (v + 0.044715 * v * v * v)))


def transformer_block_kernel(
    x_ref,
    ln1_g_ref, ln1_b_ref,
    wqkv_ref, bqkv_ref,
    wproj_ref, bproj_ref,
    ln2_g_ref, ln2_b_ref,
    wfc1_ref, bfc1_ref,
    wfc2_ref, bfc2_ref,
    o_ref,
    attn_ref,                      # VMEM scratch (Bt, S, E) f32
    *, num_heads, q_chunk, compute_dtype, approx_softmax, approx_gelu,
):
    Bt, S, E = x_ref.shape
    hd = E // num_heads
    rows = Bt * S
    scale = float(hd) ** -0.5
    cd = compute_dtype

    x = x_ref[...].astype(jnp.float32).reshape(rows, E)

    # ---- Attention branch ----
    xn1 = _layernorm(x, ln1_g_ref[...], ln1_b_ref[...])
    qkv = jnp.dot(xn1.astype(cd), wqkv_ref[...],
                  preferred_element_type=jnp.float32) + bqkv_ref[...]   # (rows, 3E) f32

    # Fold 1/sqrt(hd) into q (S*E multiplies instead of H*S*S); split heads with
    # one transpose per operand and merge (Bt, H) into a single batch dim so
    # every attention einsum has exactly one batch axis.
    q = (qkv[:, :E] * scale).astype(cd)
    k = qkv[:, E:2 * E].astype(cd)
    v = qkv[:, 2 * E:].astype(cd)

    def heads(t):                                     # (rows, E) -> (Bt*H, S, hd)
        t = t.reshape(Bt, S, num_heads, hd)
        return jnp.transpose(t, (0, 2, 1, 3)).reshape(Bt * num_heads, S, hd)

    qh, kh, vh = heads(q), heads(k), heads(v)

    # q-chunked attention: scores/probs are (Bt*H, tq, S) per chunk — never the
    # full (Bt*H, S, S) — keeping the attention VMEM footprint O(S * q_chunk).
    # The per-chunk output projection is fused into the loop and written to the
    # attn scratch, which also bounds chunk liveness.
    n_chunks = -(-S // q_chunk)
    for c in range(n_chunks):
        lo = c * q_chunk
        hi = min(S, lo + q_chunk)
        tq = hi - lo
        s = jnp.einsum('bqd,bkd->bqk', qh[:, lo:hi, :], kh,
                       preferred_element_type=jnp.float32)              # (Bt*H, tq, S)
        m = jnp.max(s, axis=-1, keepdims=True)
        if approx_softmax:
            # bf16 exp (EUP on v6e/v7x) + EUP approx reciprocal; denom stays f32.
            p = jnp.exp((s - m).astype(cd))
            den = jnp.sum(p.astype(jnp.float32), axis=-1, keepdims=True)
            p = p * pl.reciprocal(den, approx=True)
        else:
            p = jnp.exp(s - m)
            p = p / jnp.sum(p, axis=-1, keepdims=True)
        ctx = jnp.einsum('bqk,bkd->bqd', p.astype(cd), vh,
                         preferred_element_type=jnp.float32)            # (Bt*H, tq, hd)
        ctx = jnp.transpose(ctx.reshape(Bt, num_heads, tq, hd), (0, 2, 1, 3))
        ctx = ctx.reshape(Bt * tq, E)
        proj = jnp.dot(ctx.astype(cd), wproj_ref[...],
                       preferred_element_type=jnp.float32)              # (Bt*tq, E)
        attn_ref[:, lo:hi, :] = proj.reshape(Bt, tq, E)

    attn = attn_ref[...].reshape(rows, E) + bproj_ref[...]
    x1 = x + attn

    # ---- MLP branch ----
    xn2 = _layernorm(x1, ln2_g_ref[...], ln2_b_ref[...])
    h = jnp.dot(xn2.astype(cd), wfc1_ref[...],
                preferred_element_type=jnp.float32) + bfc1_ref[...]
    h = _gelu_tanh(h) if approx_gelu else _gelu_exact(h)
    h = jnp.dot(h.astype(cd), wfc2_ref[...],
                preferred_element_type=jnp.float32) + bfc2_ref[...]

    o_ref[...] = (x1 + h).reshape(Bt, S, E).astype(o_ref.dtype)


def _vmem_limit_bytes(Bt, S, E, Hm, num_heads, q_chunk, x_itemsize, w_itemsize):
    """Per-step VMEM estimate (bytes) with headroom, clamped to a
    generation-aware budget (0.75 * physical VMEM)."""
    rows = Bt * S
    tq = min(q_chunk, S)
    w_elems = E * 3 * E + E * E + E * Hm + Hm * E
    small_elems = 3 * E + E + Hm + E + 4 * E
    io_bytes = 2 * 2 * rows * E * x_itemsize                 # dbl-buffered x/out
    w_bytes = 2 * (w_elems * w_itemsize + small_elems * 4)   # dbl-buffered weights
    act_bytes = 4 * (rows * (3 * E + 8 * E + 2 * Hm)         # f32 activations
                     + 2 * Bt * num_heads * tq * S)          # per-chunk scores/probs
    act_bytes += w_itemsize * (rows * (3 * E + Hm) + Bt * num_heads * tq * S)
    est = int((io_bytes + w_bytes + act_bytes) * 1.5)

    cap = 64 * 1024 * 1024                                   # conservative fallback (v7x)
    try:
        info = pltpu.get_tpu_info()
        cap = int(getattr(info, "vmem_capacity_bytes", cap) or cap)
    except Exception:
        pass                                                  # capability probe only
    budget = int(cap * 0.75)                                  # ~96 MiB v5e/v6e, ~48 MiB v7x
    return max(min(est, budget), min(32 * 1024 * 1024, budget))


@functools.partial(
    jax.jit,
    static_argnames=("num_heads", "batch_tile", "q_chunk",
                     "use_bf16_matmul", "approx_softmax", "approx_gelu"))
def _transformer_block_impl(x, params, *, num_heads, batch_tile, q_chunk,
                            use_bf16_matmul, approx_softmax, approx_gelu):
    B, S, E = x.shape
    Hm = params["w_fc1"].shape[1]
    Bt = batch_tile
    cd = jnp.bfloat16 if use_bf16_matmul else jnp.float32
    w_itemsize = jnp.dtype(cd).itemsize

    # MXU weight operands in compute dtype (no-op when f32).  For a multi-layer
    # model, cast the params once outside instead of per call.
    w_qkv = params["w_qkv"].astype(cd)
    w_proj = params["w_proj"].astype(cd)
    w_fc1 = params["w_fc1"].astype(cd)
    w_fc2 = params["w_fc2"].astype(cd)

    kernel = functools.partial(
        transformer_block_kernel,
        num_heads=num_heads, q_chunk=q_chunk, compute_dtype=cd,
        approx_softmax=approx_softmax, approx_gelu=approx_gelu)

    def wspec(shape):
        # Constant-index weight blocks: never re-DMA'd across the batch grid.
        return pl.BlockSpec(shape, lambda i: (0, 0))

    in_specs = [
        pl.BlockSpec((Bt, S, E), lambda i: (i, 0, 0)),   # x
        wspec((1, E)), wspec((1, E)),                    # ln1 gamma / beta
        wspec((E, 3 * E)), wspec((1, 3 * E)),            # qkv
        wspec((E, E)), wspec((1, E)),                    # proj
        wspec((1, E)), wspec((1, E)),                    # ln2 gamma / beta
        wspec((E, Hm)), wspec((1, Hm)),                  # fc1
        wspec((Hm, E)), wspec((1, E)),                   # fc2
    ]
    out_spec = pl.BlockSpec((Bt, S, E), lambda i: (i, 0, 0))

    w_elems = E * 3 * E + E * E + E * Hm + Hm * E
    small_elems = 3 * E + E + Hm + E + 4 * E
    cost = pl.CostEstimate(
        flops=2 * B * S * (3 * E * E + E * E + 2 * E * Hm) + 4 * B * S * S * E,
        transcendentals=B * num_heads * S * S + B * S * Hm,
        bytes_accessed=(2 * B * S * E * x.dtype.itemsize
                        + w_elems * w_itemsize + small_elems * 4))

    return pl.pallas_call(
        kernel,
        out_shape=jax.ShapeDtypeStruct((B, S, E), x.dtype),
        grid_spec=pltpu.PrefetchScalarGridSpec(
            num_scalar_prefetch=0,
            grid=(B // Bt,),
            in_specs=in_specs,
            out_specs=out_spec,
            scratch_shapes=[pltpu.VMEM((Bt, S, E), jnp.float32)],
        ),
        compiler_params=pltpu.CompilerParams(
            dimension_semantics=("parallel",),
            vmem_limit_bytes=_vmem_limit_bytes(
                Bt, S, E, Hm, num_heads, q_chunk,
                x.dtype.itemsize, w_itemsize)),
        cost_estimate=cost,
    )(
        x,
        params["ln1_g"], params["ln1_b"],
        w_qkv, params["b_qkv"],
        w_proj, params["b_proj"],
        params["ln2_g"], params["ln2_b"],
        w_fc1, params["b_fc1"],
        w_fc2, params["b_fc2"],
    )


def _pick_batch_tile(B):
    # Largest small divisor of B that still leaves >= 2 grid steps, so both v7x
    # TensorCores get work under dimension_semantics=("parallel",).
    for bt in (4, 3, 2, 1):
        if B % bt == 0 and (B // bt >= 2 or bt == B == 1):
            return bt
    return 1


def transformer_block(x, params, num_heads, *,
                      batch_tile=None, q_chunk=None,
                      use_bf16_matmul=False, approx_softmax=False,
                      approx_gelu=False):
    """Fused ViT transformer block (eval semantics).

    use_bf16_matmul=True feeds bf16 operands to the MXU with f32 accumulation
    (recommended default on v7x); approx_softmax / approx_gelu move the
    transcendentals to the EUP at a small accuracy cost.  For best MXU / store
    efficiency keep E a multiple of 128 and S a multiple of 8.
    """
    B, S, E = x.shape
    if E % num_heads != 0:
        raise ValueError("embed_dim must be divisible by num_heads")
    if batch_tile is None:
        batch_tile = _pick_batch_tile(B)
    elif B % batch_tile != 0:
        raise ValueError(f"batch_tile={batch_tile} must divide batch={B}")
    if q_chunk is None:
        q_chunk = min(S, 256)
    q_chunk = max(1, min(int(q_chunk), S))
    # TODO(synk): B == 1 still leaves one v7x TensorCore idle; a grid-level
    # q-tile split (recomputing LN1/QKV per tile or a two-kernel split) would be
    # needed to shard a single sequence across both cores.
    return _transformer_block_impl(
        x, params, num_heads=int(num_heads), batch_tile=int(batch_tile),
        q_chunk=int(q_chunk), use_bf16_matmul=bool(use_bf16_matmul),
        approx_softmax=bool(approx_softmax), approx_gelu=bool(approx_gelu))


def reference_transformer_block(x, params, num_heads):
    B, S, E = x.shape
    hd = E // num_heads

    def ln(v, g, b):
        mu = jnp.mean(v, -1, keepdims=True)
        var = jnp.mean((v - mu) ** 2, -1, keepdims=True)
        return (v - mu) * jax.lax.rsqrt(var + 1e-5) * g + b

    xn1 = ln(x, params["ln1_g"], params["ln1_b"])
    qkv = xn1 @ params["w_qkv"] + params["b_qkv"]                # (B,S,3E)
    qkv = qkv.reshape(B, S, 3, num_heads, hd).transpose(2, 0, 3, 1, 4)
    q, k, v = (qkv[0], qkv[1], qkv[2])                           # (B,nh,S,hd)
    attn = (q @ jnp.swapaxes(k, -2, -1)) * (hd ** -0.5)
    attn = jax.nn.softmax(attn, axis=-1)
    out = (attn @ v).transpose(0, 2, 1, 3).reshape(B, S, E)
    out = out @ params["w_proj"] + params["b_proj"]
    x1 = x + out

    xn2 = ln(x1, params["ln2_g"], params["ln2_b"])
    h = jax.nn.gelu(xn2 @ params["w_fc1"] + params["b_fc1"], approximate=False)
    h = h @ params["w_fc2"] + params["b_fc2"]
    return x1 + h


def init_params(key, embed_dim, mlp_ratio):
    H = int(embed_dim * mlp_ratio)
    ks = jax.random.split(key, 8)
    sc = 0.05
    return {
        "ln1_g": jnp.ones((1, embed_dim), jnp.float32),
        "ln1_b": jnp.zeros((1, embed_dim), jnp.float32),
        "w_qkv": sc * jax.random.normal(ks[0], (embed_dim, 3 * embed_dim), jnp.float32),
        "b_qkv": sc * jax.random.normal(ks[1], (1, 3 * embed_dim), jnp.float32),
        "w_proj": sc * jax.random.normal(ks[2], (embed_dim, embed_dim), jnp.float32),
        "b_proj": sc * jax.random.normal(ks[3], (1, embed_dim), jnp.float32),
        "ln2_g": jnp.ones((1, embed_dim), jnp.float32),
        "ln2_b": jnp.zeros((1, embed_dim), jnp.float32),
        "w_fc1": sc * jax.random.normal(ks[4], (embed_dim, H), jnp.float32),
        "b_fc1": sc * jax.random.normal(ks[5], (1, H), jnp.float32),
        "w_fc2": sc * jax.random.normal(ks[6], (H, embed_dim), jnp.float32),
        "b_fc2": sc * jax.random.normal(ks[7], (1, embed_dim), jnp.float32),
    }


if __name__ == "__main__":
    B, S, E = 2, 8, 32
    num_heads = 4
    mlp_ratio = 4

    key = jax.random.PRNGKey(0)
    k_x, k_p = jax.random.split(key)
    x = jax.random.normal(k_x, (B, S, E), jnp.float32)
    params = init_params(k_p, E, mlp_ratio)

    ref = reference_transformer_block(x, params, num_heads)

    # 1) Exact numerics, default tiling (batch_tile=1 -> 2 parallel grid steps).
    out = jax.block_until_ready(transformer_block(x, params, num_heads))
    assert out.shape == (B, S, E)
    assert jnp.allclose(out, ref, rtol=1e-3, atol=1e-3), \
        f"max abs err {jnp.max(jnp.abs(out - ref))}"

    # 2) Batch-tile flattening path (both batch elements in one grid step).
    out_bt = jax.block_until_ready(
        transformer_block(x, params, num_heads, batch_tile=2))
    assert jnp.allclose(out_bt, ref, rtol=1e-3, atol=1e-3), \
        f"max abs err (batch_tile=2) {jnp.max(jnp.abs(out_bt - ref))}"

    # 3) q-chunked attention path (2 chunks of 4 query rows).
    out_qc = jax.block_until_ready(
        transformer_block(x, params, num_heads, q_chunk=4))
    assert jnp.allclose(out_qc, ref, rtol=1e-3, atol=1e-3), \
        f"max abs err (q_chunk=4) {jnp.max(jnp.abs(out_qc - ref))}"

    # 4) Performance config: bf16 MXU operands (f32 accumulation), EUP approx
    #    softmax, tanh GELU — looser tolerance by design.
    out_fast = jax.block_until_ready(
        transformer_block(x, params, num_heads,
                          use_bf16_matmul=True, approx_softmax=True,
                          approx_gelu=True))
    assert jnp.allclose(out_fast, ref, rtol=5e-2, atol=5e-2), \
        f"max abs err (bf16/approx) {jnp.max(jnp.abs(out_fast - ref))}"

    print("KERNEL_OK")
</pallas_src>

<mosaic_0001>
module attributes {stable_mosaic.version = 11 : i64} {
  func.func @transformer_block_kernel(%arg0: i32, %arg1: memref<1x8x32xf32, #tpu.memory_space<vmem>>, %arg2: memref<1x32xf32, #tpu.memory_space<vmem>>, %arg3: memref<1x32xf32, #tpu.memory_space<vmem>>, %arg4: memref<32x96xf32, #tpu.memory_space<vmem>>, %arg5: memref<1x96xf32, #tpu.memory_space<vmem>>, %arg6: memref<32x32xf32, #tpu.memory_space<vmem>>, %arg7: memref<1x32xf32, #tpu.memory_space<vmem>>, %arg8: memref<1x32xf32, #tpu.memory_space<vmem>>, %arg9: memref<1x32xf32, #tpu.memory_space<vmem>>, %arg10: memref<32x128xf32, #tpu.memory_space<vmem>>, %arg11: memref<1x128xf32, #tpu.memory_space<vmem>>, %arg12: memref<128x32xf32, #tpu.memory_space<vmem>>, %arg13: memref<1x32xf32, #tpu.memory_space<vmem>>, %arg14: memref<1x8x32xf32, #tpu.memory_space<vmem>>, %arg15: memref<1x8x32xf32, #tpu.memory_space<vmem>>) attributes {dimension_semantics = [#tpu.dimension_semantics<parallel>], iteration_bounds = array<i64: 2>, scalar_prefetch = 0 : i64, scratch_operands = 1 : i64, tpu.core_type = #tpu.core_type<tc>, window_params = [{transform_indices = @transform_0, window_bounds = array<i64: 1, 8, 32>}, {pipeline_mode = #tpu.pipeline_mode<synchronous>, transform_indices = @transform_1, window_bounds = array<i64: 1, 32>}, {pipeline_mode = #tpu.pipeline_mode<synchronous>, transform_indices = @transform_2, window_bounds = array<i64: 1, 32>}, {pipeline_mode = #tpu.pipeline_mode<synchronous>, transform_indices = @transform_3, window_bounds = array<i64: 32, 96>}, {pipeline_mode = #tpu.pipeline_mode<synchronous>, transform_indices = @transform_4, window_bounds = array<i64: 1, 96>}, {pipeline_mode = #tpu.pipeline_mode<synchronous>, transform_indices = @transform_5, window_bounds = array<i64: 32, 32>}, {pipeline_mode = #tpu.pipeline_mode<synchronous>, transform_indices = @transform_6, window_bounds = array<i64: 1, 32>}, {pipeline_mode = #tpu.pipeline_mode<synchronous>, transform_indices = @transform_7, window_bounds = array<i64: 1, 32>}, {pipeline_mode = #tpu.pipeline_mode<synchronous>, transform_indices = @transform_8, window_bounds = array<i64: 1, 32>}, {pipeline_mode = #tpu.pipeline_mode<synchronous>, transform_indices = @transform_9, window_bounds = array<i64: 32, 128>}, {pipeline_mode = #tpu.pipeline_mode<synchronous>, transform_indices = @transform_10, window_bounds = array<i64: 1, 128>}, {pipeline_mode = #tpu.pipeline_mode<synchronous>, transform_indices = @transform_11, window_bounds = array<i64: 128, 32>}, {pipeline_mode = #tpu.pipeline_mode<synchronous>, transform_indices = @transform_12, window_bounds = array<i64: 1, 32>}, {transform_indices = @transform_13, window_bounds = array<i64: 1, 8, 32>}]} {
    %c0 = arith.constant 0 : index
    %c0_0 = arith.constant 0 : index
    %c0_1 = arith.constant 0 : index
    %0 = vector.load %arg1[%c0, %c0_0, %c0_1] : memref<1x8x32xf32, #tpu.memory_space<vmem>>, vector<1x8x32xf32>
    %1 = vector.shape_cast %0 : vector<1x8x32xf32> to vector<8x32xf32>
    %c0_2 = arith.constant 0 : index
    %c0_3 = arith.constant 0 : index
    %2 = vector.load %arg2[%c0_2, %c0_3] : memref<1x32xf32, #tpu.memory_space<vmem>>, vector<1x32xf32>
    %c0_4 = arith.constant 0 : index
    %c0_5 = arith.constant 0 : index
    %3 = vector.load %arg3[%c0_4, %c0_5] : memref<1x32xf32, #tpu.memory_space<vmem>>, vector<1x32xf32>
    %cst = arith.constant dense<0.000000e+00> : vector<8xf32>
    %4 = vector.multi_reduction <add>, %1, %cst [1] : vector<8x32xf32> to vector<8xf32>
    %5 = vector.shape_cast %4 : vector<8xf32> to vector<8x1xf32>
    %cst_6 = arith.constant 3.200000e+01 : f32
    %6 = vector.broadcast %cst_6 : f32 to vector<8x1xf32>
    %7 = arith.divf %5, %6 : vector<8x1xf32>
    %8 = vector.broadcast %7 : vector<8x1xf32> to vector<8x32xf32>
    %9 = arith.subf %1, %8 : vector<8x32xf32>
    %10 = arith.mulf %9, %9 : vector<8x32xf32>
    %cst_7 = arith.constant dense<0.000000e+00> : vector<8xf32>
    %11 = vector.multi_reduction <add>, %10, %cst_7 [1] : vector<8x32xf32> to vector<8xf32>
    %12 = vector.shape_cast %11 : vector<8xf32> to vector<8x1xf32>
    %cst_8 = arith.constant 3.200000e+01 : f32
    %13 = vector.broadcast %cst_8 : f32 to vector<8x1xf32>
    %14 = arith.divf %12, %13 : vector<8x1xf32>
    %15 = vector.broadcast %7 : vector<8x1xf32> to vector<8x32xf32>
    %16 = arith.subf %1, %15 : vector<8x32xf32>
    %cst_9 = arith.constant 9.99999974E-6 : f32
    %17 = vector.broadcast %cst_9 : f32 to vector<8x1xf32>
    %18 = arith.addf %14, %17 : vector<8x1xf32>
    %19 = math.rsqrt %18 : vector<8x1xf32>
    %20 = vector.broadcast %19 : vector<8x1xf32> to vector<8x32xf32>
    %21 = arith.mulf %16, %20 : vector<8x32xf32>
    %22 = vector.broadcast %2 : vector<1x32xf32> to vector<8x32xf32>
    %23 = arith.mulf %21, %22 : vector<8x32xf32>
    %24 = vector.broadcast %3 : vector<1x32xf32> to vector<8x32xf32>
    %25 = arith.addf %23, %24 : vector<8x32xf32>
    %c0_10 = arith.constant 0 : index
    %c0_11 = arith.constant 0 : index
    %26 = vector.load %arg4[%c0_10, %c0_11] : memref<32x96xf32, #tpu.memory_space<vmem>>, vector<32x96xf32>
    %cst_12 = arith.constant dense<0.000000e+00> : vector<8x96xf32>
    %27 = tpu.matmul %25, %26, %cst_12 {dimension_numbers = #tpu.dot_dimension_numbers<[1], [0], [0], [1], [0, 0, 1, 1], [], []>} : vector<8x32xf32>, vector<32x96xf32>, vector<8x96xf32> -> vector<8x96xf32>
    %c0_13 = arith.constant 0 : index
    %c0_14 = arith.constant 0 : index
    %28 = vector.load %arg5[%c0_13, %c0_14] : memref<1x96xf32, #tpu.memory_space<vmem>>, vector<1x96xf32>
    %29 = vector.broadcast %28 : vector<1x96xf32> to vector<8x96xf32>
    %30 = arith.addf %27, %29 : vector<8x96xf32>
    %31 = vector.extract_strided_slice %30 {offsets = [0, 0], sizes = [8, 32], strides = [1, 1]} : vector<8x96xf32> to vector<8x32xf32>
    %cst_15 = arith.constant 0.353553385 : f32
    %32 = vector.broadcast %cst_15 : f32 to vector<8x32xf32>
    %33 = arith.mulf %31, %32 : vector<8x32xf32>
    %34 = vector.extract_strided_slice %30 {offsets = [0, 32], sizes = [8, 32], strides = [1, 1]} : vector<8x96xf32> to vector<8x32xf32>
    %35 = vector.extract_strided_slice %30 {offsets = [0, 64], sizes = [8, 32], strides = [1, 1]} : vector<8x96xf32> to vector<8x32xf32>
    %36 = vector.shape_cast %33 : vector<8x32xf32> to vector<1x8x4x8xf32>
    %37 = tpu.transpose %36, [0, 2, 1, 3] : vector<1x8x4x8xf32> -> vector<1x4x8x8xf32>
    %38 = vector.shape_cast %37 : vector<1x4x8x8xf32> to vector<4x8x8xf32>
    %39 = vector.shape_cast %34 : vector<8x32xf32> to vector<1x8x4x8xf32>
    %40 = tpu.transpose %39, [0, 2, 1, 3] : vector<1x8x4x8xf32> -> vector<1x4x8x8xf32>
    %41 = vector.shape_cast %40 : vector<1x4x8x8xf32> to vector<4x8x8xf32>
    %42 = vector.shape_cast %35 : vector<8x32xf32> to vector<1x8x4x8xf32>
    %43 = tpu.transpose %42, [0, 2, 1, 3] : vector<1x8x4x8xf32> -> vector<1x4x8x8xf32>
    %44 = vector.shape_cast %43 : vector<1x4x8x8xf32> to vector<4x8x8xf32>
    "tpu.trace_start"() <{level = 10 : i32, message = "bqd,bkd->bqk"}> : () -> ()
    %cst_16 = arith.constant dense<0.000000e+00> : vector<4x8x8xf32>
    %45 = tpu.matmul %38, %41, %cst_16 {dimension_numbers = #tpu.dot_dimension_numbers<[2], [2], [1], [1], [0, 0, 0, 1, 1, 1], [0], [0]>} : vector<4x8x8xf32>, vector<4x8x8xf32>, vector<4x8x8xf32> -> vector<4x8x8xf32>
    "tpu.trace_stop"() : () -> ()
    %cst_17 = arith.constant dense<0xFF800000> : vector<4x8xf32>
    %46 = vector.multi_reduction <maximumf>, %45, %cst_17 [2] : vector<4x8x8xf32> to vector<4x8xf32>
    %47 = vector.shape_cast %46 : vector<4x8xf32> to vector<4x8x1xf32>
    %48 = vector.broadcast %47 : vector<4x8x1xf32> to vector<4x8x8xf32>
    %49 = arith.subf %45, %48 : vector<4x8x8xf32>
    %50 = math.exp %49 : vector<4x8x8xf32>
    %cst_18 = arith.constant dense<0.000000e+00> : vector<4x8xf32>
    %51 = vector.multi_reduction <add>, %50, %cst_18 [2] : vector<4x8x8xf32> to vector<4x8xf32>
    %52 = vector.shape_cast %51 : vector<4x8xf32> to vector<4x8x1xf32>
    %53 = vector.broadcast %52 : vector<4x8x1xf32> to vector<4x8x8xf32>
    %54 = arith.divf %50, %53 : vector<4x8x8xf32>
    "tpu.trace_start"() <{level = 10 : i32, message = "bqk,bkd->bqd"}> : () -> ()
    %cst_19 = arith.constant dense<0.000000e+00> : vector<4x8x8xf32>
    %55 = tpu.matmul %54, %44, %cst_19 {dimension_numbers = #tpu.dot_dimension_numbers<[2], [1], [1], [2], [0, 0, 0, 1, 1, 2], [0], [0]>} : vector<4x8x8xf32>, vector<4x8x8xf32>, vector<4x8x8xf32> -> vector<4x8x8xf32>
    "tpu.trace_stop"() : () -> ()
    %56 = vector.shape_cast %55 : vector<4x8x8xf32> to vector<1x4x8x8xf32>
    %57 = tpu.transpose %56, [0, 2, 1, 3] : vector<1x4x8x8xf32> -> vector<1x8x4x8xf32>
    %58 = vector.shape_cast %57 : vector<1x8x4x8xf32> to vector<8x32xf32>
    %c0_20 = arith.constant 0 : index
    %c0_21 = arith.constant 0 : index
    %59 = vector.load %arg6[%c0_20, %c0_21] : memref<32x32xf32, #tpu.memory_space<vmem>>, vector<32x32xf32>
    %cst_22 = arith.constant dense<0.000000e+00> : vector<8x32xf32>
    %60 = tpu.matmul %58, %59, %cst_22 {dimension_numbers = #tpu.dot_dimension_numbers<[1], [0], [0], [1], [0, 0, 1, 1], [], []>} : vector<8x32xf32>, vector<32x32xf32>, vector<8x32xf32> -> vector<8x32xf32>
    %61 = vector.shape_cast %60 : vector<8x32xf32> to vector<1x8x32xf32>
    %c0_23 = arith.constant 0 : index
    %c0_24 = arith.constant 0 : index
    %c0_25 = arith.constant 0 : index
    %62 = vector.load %arg15[%c0_23, %c0_24, %c0_25] : memref<1x8x32xf32, #tpu.memory_space<vmem>>, vector<1x8x32xf32>
    tpu.vector_store %arg15[%c0_23, %c0_24, %c0_25], %61 {strides = array<i32>} : memref<1x8x32xf32, #tpu.memory_space<vmem>>, vector<1x8x32xf32>,
    %c0_26 = arith.constant 0 : index
    %c0_27 = arith.constant 0 : index
    %c0_28 = arith.constant 0 : index
    %63 = vector.load %arg15[%c0_26, %c0_27, %c0_28] : memref<1x8x32xf32, #tpu.memory_space<vmem>>, vector<1x8x32xf32>
    %64 = vector.shape_cast %63 : vector<1x8x32xf32> to vector<8x32xf32>
    %c0_29 = arith.constant 0 : index
    %c0_30 = arith.constant 0 : index
    %65 = vector.load %arg7[%c0_29, %c0_30] : memref<1x32xf32, #tpu.memory_space<vmem>>, vector<1x32xf32>
    %66 = vector.broadcast %65 : vector<1x32xf32> to vector<8x32xf32>
    %67 = arith.addf %64, %66 : vector<8x32xf32>
    %68 = arith.addf %1, %67 : vector<8x32xf32>
    %c0_31 = arith.constant 0 : index
    %c0_32 = arith.constant 0 : index
    %69 = vector.load %arg8[%c0_31, %c0_32] : memref<1x32xf32, #tpu.memory_space<vmem>>, vector<1x32xf32>
    %c0_33 = arith.constant 0 : index
    %c0_34 = arith.constant 0 : index
    %70 = vector.load %arg9[%c0_33, %c0_34] : memref<1x32xf32, #tpu.memory_space<vmem>>, vector<1x32xf32>
    %cst_35 = arith.constant dense<0.000000e+00> : vector<8xf32>
    %71 = vector.multi_reduction <add>, %68, %cst_35 [1] : vector<8x32xf32> to vector<8xf32>
    %72 = vector.shape_cast %71 : vector<8xf32> to vector<8x1xf32>
    %cst_36 = arith.constant 3.200000e+01 : f32
    %73 = vector.broadcast %cst_36 : f32 to vector<8x1xf32>
    %74 = arith.divf %72, %73 : vector<8x1xf32>
    %75 = vector.broadcast %74 : vector<8x1xf32> to vector<8x32xf32>
    %76 = arith.subf %68, %75 : vector<8x32xf32>
    %77 = arith.mulf %76, %76 : vector<8x32xf32>
    %cst_37 = arith.constant dense<0.000000e+00> : vector<8xf32>
    %78 = vector.multi_reduction <add>, %77, %cst_37 [1] : vector<8x32xf32> to vector<8xf32>
    %79 = vector.shape_cast %78 : vector<8xf32> to vector<8x1xf32>
    %cst_38 = arith.constant 3.200000e+01 : f32
    %80 = vector.broadcast %cst_38 : f32 to vector<8x1xf32>
    %81 = arith.divf %79, %80 : vector<8x1xf32>
    %82 = vector.broadcast %74 : vector<8x1xf32> to vector<8x32xf32>
    %83 = arith.subf %68, %82 : vector<8x32xf32>
    %cst_39 = arith.constant 9.99999974E-6 : f32
    %84 = vector.broadcast %cst_39 : f32 to vector<8x1xf32>
    %85 = arith.addf %81, %84 : vector<8x1xf32>
    %86 = math.rsqrt %85 : vector<8x1xf32>
    %87 = vector.broadcast %86 : vector<8x1xf32> to vector<8x32xf32>
    %88 = arith.mulf %83, %87 : vector<8x32xf32>
    %89 = vector.broadcast %69 : vector<1x32xf32> to vector<8x32xf32>
    %90 = arith.mulf %88, %89 : vector<8x32xf32>
    %91 = vector.broadcast %70 : vector<1x32xf32> to vector<8x32xf32>
    %92 = arith.addf %90, %91 : vector<8x32xf32>
    %c0_40 = arith.constant 0 : index
    %c0_41 = arith.constant 0 : index
    %93 = vector.load %arg10[%c0_40, %c0_41] : memref<32x128xf32, #tpu.memory_space<vmem>>, vector<32x128xf32>
    %cst_42 = arith.constant dense<0.000000e+00> : vector<8x128xf32>
    %94 = tpu.matmul %92, %93, %cst_42 {dimension_numbers = #tpu.dot_dimension_numbers<[1], [0], [0], [1], [0, 0, 1, 1], [], []>} : vector<8x32xf32>, vector<32x128xf32>, vector<8x128xf32> -> vector<8x128xf32>
    %c0_43 = arith.constant 0 : index
    %c0_44 = arith.constant 0 : index
    %95 = vector.load %arg11[%c0_43, %c0_44] : memref<1x128xf32, #tpu.memory_space<vmem>>, vector<1x128xf32>
    %96 = vector.broadcast %95 : vector<1x128xf32> to vector<8x128xf32>
    %97 = arith.addf %94, %96 : vector<8x128xf32>
    %cst_45 = arith.constant 5.000000e-01 : f32
    %98 = vector.broadcast %cst_45 : f32 to vector<8x128xf32>
    %99 = arith.mulf %98, %97 : vector<8x128xf32>
    %cst_46 = arith.constant 0.707106769 : f32
    %100 = vector.broadcast %cst_46 : f32 to vector<8x128xf32>
    %101 = arith.mulf %97, %100 : vector<8x128xf32>
    %102 = math.erf %101 : vector<8x128xf32>
    %cst_47 = arith.constant 1.000000e+00 : f32
    %103 = vector.broadcast %cst_47 : f32 to vector<8x128xf32>
    %104 = arith.addf %103, %102 : vector<8x128xf32>
    %105 = arith.mulf %99, %104 : vector<8x128xf32>
    %c0_48 = arith.constant 0 : index
    %c0_49 = arith.constant 0 : index
    %106 = vector.load %arg12[%c0_48, %c0_49] : memref<128x32xf32, #tpu.memory_space<vmem>>, vector<128x32xf32>
    %cst_50 = arith.constant dense<0.000000e+00> : vector<8x32xf32>
    %107 = tpu.matmul %105, %106, %cst_50 {dimension_numbers = #tpu.dot_dimension_numbers<[1], [0], [0], [1], [0, 0, 1, 1], [], []>} : vector<8x128xf32>, vector<128x32xf32>, vector<8x32xf32> -> vector<8x32xf32>
    %c0_51 = arith.constant 0 : index
    %c0_52 = arith.constant 0 : index
    %108 = vector.load %arg13[%c0_51, %c0_52] : memref<1x32xf32, #tpu.memory_space<vmem>>, vector<1x32xf32>
    %109 = vector.broadcast %108 : vector<1x32xf32> to vector<8x32xf32>
    %110 = arith.addf %107, %109 : vector<8x32xf32>
    %111 = arith.addf %68, %110 : vector<8x32xf32>
    %112 = vector.shape_cast %111 : vector<8x32xf32> to vector<1x8x32xf32>
    %c0_53 = arith.constant 0 : index
    %c0_54 = arith.constant 0 : index
    %c0_55 = arith.constant 0 : index
    %113 = vector.load %arg14[%c0_53, %c0_54, %c0_55] : memref<1x8x32xf32, #tpu.memory_space<vmem>>, vector<1x8x32xf32>
    tpu.vector_store %arg14[%c0_53, %c0_54, %c0_55], %112 {strides = array<i32>} : memref<1x8x32xf32, #tpu.memory_space<vmem>>, vector<1x8x32xf32>,
    return
  }
  func.func @transform_0(%arg0: i32) -> (i32, i32, i32) {
    %c0_i32 = arith.constant 0 : i32
    %c0_i32_0 = arith.constant 0 : i32
    %c0_i32_1 = arith.constant 0 : i32
    return %arg0, %c0_i32, %c0_i32_0 : i32, i32, i32
  }
  func.func @transform_1(%arg0: i32) -> (i32, i32) {
    %c0_i32 = arith.constant 0 : i32
    %c0_i32_0 = arith.constant 0 : i32
    %c0_i32_1 = arith.constant 0 : i32
    return %c0_i32, %c0_i32_0 : i32, i32
  }
  func.func @transform_2(%arg0: i32) -> (i32, i32) {
    %c0_i32 = arith.constant 0 : i32
    %c0_i32_0 = arith.constant 0 : i32
    %c0_i32_1 = arith.constant 0 : i32
    return %c0_i32, %c0_i32_0 : i32, i32
  }
  func.func @transform_3(%arg0: i32) -> (i32, i32) {
    %c0_i32 = arith.constant 0 : i32
    %c0_i32_0 = arith.constant 0 : i32
    %c0_i32_1 = arith.constant 0 : i32
    return %c0_i32, %c0_i32_0 : i32, i32
  }
  func.func @transform_4(%arg0: i32) -> (i32, i32) {
    %c0_i32 = arith.constant 0 : i32
    %c0_i32_0 = arith.constant 0 : i32
    %c0_i32_1 = arith.constant 0 : i32
    return %c0_i32, %c0_i32_0 : i32, i32
  }
  func.func @transform_5(%arg0: i32) -> (i32, i32) {
    %c0_i32 = arith.constant 0 : i32
    %c0_i32_0 = arith.constant 0 : i32
    %c0_i32_1 = arith.constant 0 : i32
    return %c0_i32, %c0_i32_0 : i32, i32
  }
  func.func @transform_6(%arg0: i32) -> (i32, i32) {
    %c0_i32 = arith.constant 0 : i32
    %c0_i32_0 = arith.constant 0 : i32
    %c0_i32_1 = arith.constant 0 : i32
    return %c0_i32, %c0_i32_0 : i32, i32
  }
  func.func @transform_7(%arg0: i32) -> (i32, i32) {
    %c0_i32 = arith.constant 0 : i32
    %c0_i32_0 = arith.constant 0 : i32
    %c0_i32_1 = arith.constant 0 : i32
    return %c0_i32, %c0_i32_0 : i32, i32
  }
  func.func @transform_8(%arg0: i32) -> (i32, i32) {
    %c0_i32 = arith.constant 0 : i32
    %c0_i32_0 = arith.constant 0 : i32
    %c0_i32_1 = arith.constant 0 : i32
    return %c0_i32, %c0_i32_0 : i32, i32
  }
  func.func @transform_9(%arg0: i32) -> (i32, i32) {
    %c0_i32 = arith.constant 0 : i32
    %c0_i32_0 = arith.constant 0 : i32
    %c0_i32_1 = arith.constant 0 : i32
    return %c0_i32, %c0_i32_0 : i32, i32
  }
  func.func @transform_10(%arg0: i32) -> (i32, i32) {
    %c0_i32 = arith.constant 0 : i32
    %c0_i32_0 = arith.constant 0 : i32
    %c0_i32_1 = arith.constant 0 : i32
    return %c0_i32, %c0_i32_0 : i32, i32
  }
  func.func @transform_11(%arg0: i32) -> (i32, i32) {
    %c0_i32 = arith.constant 0 : i32
    %c0_i32_0 = arith.constant 0 : i32
    %c0_i32_1 = arith.constant 0 : i32
    return %c0_i32, %c0_i32_0 : i32, i32
  }
  func.func @transform_12(%arg0: i32) -> (i32, i32) {
    %c0_i32 = arith.constant 0 : i32
    %c0_i32_0 = arith.constant 0 : i32
    %c0_i32_1 = arith.constant 0 : i32
    return %c0_i32, %c0_i32_0 : i32, i32
  }
  func.func @transform_13(%arg0: i32) -> (i32, i32, i32) {
    %c0_i32 = arith.constant 0 : i32
    %c0_i32_0 = arith.constant 0 : i32
    %c0_i32_1 = arith.constant 0 : i32
    return %arg0, %c0_i32, %c0_i32_0 : i32, i32, i32
  }
}

</mosaic_0001>

<bundles_post_ra>
// kernel: _transformer_block_impl.1
= control target key start
LH: loop header
LB: loop body
LE: loop exit
PB: predicated region body
PF: predicated region fallthrough
CT: control target
= control target key end

     0   :  { %s3029_s0 = inlined_call_operand.vmem [shape: f32[2,8,32], index: 0, kind: input, shape index: {}]   ;;  %s3030_s1 = inlined_call_operand.vmem [shape: f32[1,32], index: 1, kind: input, shape index: {}]   ;;  %s3031_s2 = inlined_call_operand.vmem [shape: f32[1,32], index: 2, kind: input, shape index: {}]   ;;  %s3032_s3 = inlined_call_operand.vmem [shape: f32[32,96], index: 3, kind: input, shape index: {}]   ;;  %s3033_s4 = inlined_call_operand.vmem [shape: f32[1,96], index: 4, kind: input, shape index: {}]   ;;  %s3034_s5 = inlined_call_operand.vmem [shape: f32[32,32], index: 5, kind: input, shape index: {}]   ;;  %s3035_s6 = inlined_call_operand.vmem [shape: f32[1,32], index: 6, kind: input, shape index: {}]   ;;  %s3036_s7 = inlined_call_operand.vmem [shape: f32[1,32], index: 7, kind: input, shape index: {}]   ;;  %s3037_s8 = inlined_call_operand.vmem [shape: f32[1,32], index: 8, kind: input, shape index: {}]   ;;  %s3038_s9 = inlined_call_operand.vmem [shape: f32[32,128], index: 9, kind: input, shape index: {}]   ;;  %s3039_s10 = inlined_call_operand.vmem [shape: f32[1,128], index: 10, kind: input, shape index: {}]   ;;  %s3040_s11 = inlined_call_operand.vmem [shape: f32[128,32], index: 11, kind: input, shape index: {}]   ;;  %s3041_s12 = inlined_call_operand.vmem [shape: f32[1,32], index: 12, kind: input, shape index: {}]   ;;  %s3042_s13 = inlined_call_operand.hbm [shape: f32[2,8,32], index: 13, kind: output, shape index: {}]  }
   0x1   :  { %3043 = sst [smem:[#allocation6_spill]] %s3029_s0 }
   0x2   :  { %3044 = sst [smem:[#allocation7_spill]] %s3030_s1 }
   0x3   :  { %3045 = sst [smem:[#allocation8_spill]] %s3031_s2 }
   0x4   :  { %18 = vsyncpa [#allocation4], 0 }
   0x5   :  { %20 = vsyncpa [#allocation4 + $0x1], 0  ;;  %s2631_s25 = smov 0   ;;  %s2633_s26 = smov 0  }
   0x6   :  { %s2635_s27 = smov 0   ;;  %s2637_s28 = smov 0  }
   0x7 LB: > { %s2652_s29 = sadd.s32 4294967295, %s2545_s28   ;;  %s2170_s30 = sadd.s32 4294967294, %s2545_s28   ;;  %s2545_s28 = sphi %s2637_s28, %s3054_s28   ;;  %s2541_s27 = sphi %s2635_s27, %s3053_s27   ;;  %s2537_s26 = sphi %s2633_s26, %s3052_s26   ;;  %s2533_s25 = sphi %s2631_s25, %s3051_s25  }
   0x8   : > { %s2656_s14 = sadd.s32 1, %s2545_s28   ;;  %s311_s15 = sadd.s32 1, %s2541_s27 }
   0x9   : > { %s308_s16 = ssub.s32 %s2545_s28, %s2656_s14  ;;  %p321_p0 = scmp.ne.s32.totalorder %s2541_s27, %s2537_s26 }
   0xa   : > { %p309_p1 = scmp.eq.s32.totalorder %s308_s16, 0  ;;  %p322_p2 = scmp.eq.s32.totalorder %s2652_s29, 1 }
   0xb   : > { %p327_p3 = scmp.ne.s32.totalorder %s2537_s26, %s2533_s25  ;;  %p328_p4 = scmp.eq.s32.totalorder %s2170_s30, 1 }
   0xc   : > { %s2667_s17 = scalar_select %p309_p1, %s2541_s27, %s311_s15  }
   0xd   : > { %p2669_p5 = por %p322_p2, %p321_p0  ;;  %p2673_p6 = por %p328_p4, %p327_p3 }
   0xe   : > { %p2173_p7 = scmp.ge.s32.totalorder %s2545_s28, 1  ;;  %p389_p8 = scmp.lt.s32.totalorder %s2545_s28, 3 }
  0x10   : > { %p390_p9 = pnand %p2173_p7, %p389_p8 }
  0x11   : > { %p432_p10 = scmp.lt.s32.totalorder (!%p390_p9), %s2652_s29, 1  ;;  %vm439_vm0 = vcmask (!%p390_p9), 261120   ;;  %s3048_s0 = sld [smem:[#allocation6_spill]] (!%p390_p9)  ;;  %v468_v7 = vld [vmem:[%s3032_s3] sm:$0xff] (!%p390_p9)  ;;  %v469_v8 = vld [vmem:[%s3032_s3 + $0x8] sm:$0xff] (!%p390_p9)  ;;  %v470_v9 = vld [vmem:[%s3032_s3 + $0x10] sm:$0xff] (!%p390_p9)  ;;  %v568_v37 = vlaneseq (!%p390_p9) }
  0x12   : > { %393 = sbr.rel (%p390_p9) target bundleno = 2715 (0xa9b), region = 72  ;;  %v2547_v10 = vmov (!%p390_p9), 0.0|0.0   ;;  %v2368_v11 = vpack.c.bf16 (!%p390_p9), %v469_v8, %v468_v7  ;;  %v471_v12 = vld [vmem:[%s3032_s3 + $0x18] sm:$0xff] (!%p390_p9)  ;;  %vm2548_vm1 = vmmov (!%p390_p9), 0   ;;  %v2549_v13 = vmov (!%p390_p9), 0.0   ;;  %s3049_s1 = sld [smem:[#allocation7_spill]] (!%p390_p9) }
  0x13   : > { %2367 = vmatprep.subr.bf16.mxu1 (!%p390_p9), %v2547_v10  ;;  %2267 = vmatprep.mubr.msk.f32.mxu1 (!%p390_p9), %vm2548_vm1, %v2549_v13  ;;  %v2371_v14 = vpack.c.bf16 (!%p390_p9), %v471_v12, %v470_v9  ;;  %s3050_s2 = sld [smem:[#allocation8_spill]] (!%p390_p9)  ;;  %v2178_v24 = vld [vmem:[%s3033_s4] ss:$0 sm:$0xff] (!%p390_p9)  ;;  %s2550_s23 = smov (!%p390_p9), 104   ;;  %v2554_v35 = vmov (!%p390_p9), 1983009808  }
  0x14   : > { %2280 = vmatprep.subr.mxu0 (!%p390_p9), %v2549_v13  ;;  %2282 = vmatprep.mubr.msk.f32.mxu0 (!%p390_p9), %vm2548_vm1, %v2549_v13  ;;  %s2552_s30 = smov (!%p390_p9), 112   ;;  %s2553_s15 = smov (!%p390_p9), 96   ;;  %v566_v36 = vunpack.c.l.s4 (!%p390_p9), %v2554_v35  ;;  %v2555_v38 = vmov (!%p390_p9), 1934713408   ;;  %v569_v42 = vshrl.u32 (!%p390_p9), %v568_v37, 7  ;;  %vm1002_vm2 = vcmask (!%p390_p9), 64512  }
  0x15   : > { %2369 = vmatpush3.bf16.msra.mxu1 (!%p390_p9), %v2368_v11  ;;  %v598_v39 = vunpack.c.l.s4 (!%p390_p9), %v2555_v38  ;;  %s2556_s16 = smov (!%p390_p9), 64   ;;  %s2559_s22 = smov (!%p390_p9), 24   ;;  %vm1792_vm3 = vcmask (!%p390_p9), 130048   ;;  %vm1794_vm4 = vcmask (!%p390_p9), 195584  }
  0x16   : > { %2370 = vmatprep.subr.bf16.mxu1 (!%p390_p9), %v2547_v10  ;;  %v567_v41 = vunpack.c.0.s8 (!%p390_p9), %v566_v36 }
  0x17   : > { %v599_v43 = vunpack.c.0.s8 (!%p390_p9), %v598_v39 }
  0x18   : > { %v2176_v19 = vld [vmem:[%s3049_s1] ss:$0 sm:$0xff] (!%p390_p9)  ;;  %v2738_v47 = vsub.s32 (!%p390_p9), %v567_v41, %v569_v42 }
  0x19   : > { %s433_s20 = scalar_select %p432_p10, %s2652_s29, 1  ;;  %2372 = vmatpush3.bf16.msra.mxu1 %v2371_v14  ;;  %v2177_v21 = vld [vmem:[%s3050_s2] ss:$0 sm:$0xff]  ;;  %v2740_v50 = vsub.s32 %v599_v43, %v569_v42 }
  0x1a   : > { %2270 = vmatprep.subr.mxu1 %v2549_v13 }
  0x1b   : > { %s2175_s21 = sshll.u32 %s433_s20, 3  ;;  %s2557_s20 = smov 16  }
  0x1c   : > { %s435_s24 = scalar_lea.vmem %s3048_s0, %s2175_s21  ;;  %s2558_s21 = smov 8  }
  0x1d   : > { %v2684_v0 = vld [vmem:[%s435_s24] sm:$0xff]  ;;  %s2551_s24 = smov 120   ;;  %s2208_s0 = sshll.u32 %s2652_s29, 7 }
  0x1e   : > { %v440_v1 = vsel %vm439_vm0, %v2684_v0, 0.0 }
  0x1f   : > { %441 = vadd.xlane.f32.xlu0 %v440_v1 }
  0xac   : > { %v442_v2 = vpop.xlane.xlu0 %441 }
  0xad   : > { %v444_v3 = vmul.f32 0.03125, %v442_v2 }
  0xaf   : > { %v445_v4 = vsub.f32 %v2684_v0, %v444_v3 }
  0xb1   : > { %v446_v5 = vmul.f32 %v445_v4, %v445_v4 }
  0xb3   : > { %v447_v6 = vsel %vm439_vm0, %v446_v5, 0.0 }
  0xb4   : > { %448 = vadd.xlane.f32.xlu0 %v447_v6 }
 0x141   : > { %v449_v15 = vpop.xlane.xlu0 %448 }
 0x142   : > { %v450_v16 = vmul.f32 0.03125, %v449_v15 }
 0x144   : > { %v451_v17 = vadd.f32 1e-05, %v450_v16 }
 0x146   : > { %2461 = vrsqrt.f32 %v451_v17 }
 0x150   : > { %v2462_v18 = vpop.eup %2461 }
 0x151   : > { %v453_v20 = vmul.f32 %v2462_v18, %v445_v4 }
 0x153   : > { %v460_v22 = vmul.f32 %v2176_v19, %v453_v20 }
 0x155   : > { %v467_v23 = vadd.f32 %v2177_v21, %v460_v22 }
 0x157   : > { %2268 = vmatmul.mubr.msk.f32.vlgmr.msra.gmra.mrb[0].mxu1 %vm439_vm0, %v467_v23 }
 0x158   : > { %2272 = vmatprep.mubr.msk.f32.mxu1 %vm2548_vm1, %v2549_v13 }
 0x22a   : > { %v548_v25 = vpop.f32.mrb[0].mxu1 }
 0x22b   : > { %v2722_v26 = vadd.f32 %v2178_v24, %v548_v25  ;;  %v2269_v27 = vpop.f32.mrb[1].mxu1 }
 0x22d   : > { %704 = vrot.lane.b32.xlu0 %v2722_v26, %s2550_s23  ;;  %700 = vrot.lane.b32.xlu1 %v2722_v26, %s2551_s24  ;;  %v552_v28 = vmul.f32 0.35355338, %v2722_v26 }
 0x231   : > { %702 = vrot.lane.b32.xlu1 %v2722_v26, %s2552_s30  ;;  %560 = vrot.lane.b32.xlu0 %v552_v28, %s2550_s23  ;;  %s429_s23 = sand.u32 1, %s2537_s26  }
 0x235   : > { %706 = vrot.lane.b32.xlu1 %v2722_v26, %s2553_s15 }
 0x239   : > { %554 = vrot.lane.b32.xlu1 %v552_v28, %s2551_s24  ;;  %s2174_s24 = sshll.u32 %s429_s23, 3 }
 0x23a   : > { %s431_s1 = scalar_lea.vmem [#allocation3], %s2174_s24  ;;  %s2560_s24 = smov [#allocation3]  }
 0x29f   : > { %v2729_v29 = vpop.permute.xlu1 %700  ;;  %v2735_v31 = vpop.permute.xlu0 %704 }
 0x2a0   : > { %708 = vrot.lane.b32.xlu1 %v2729_v29, %s2553_s15 }
 0x2a3   : > { %v2732_v30 = vpop.permute.xlu1 %702  ;;  %v561_v51 = vpop.permute.xlu0 %560 }
 0x2a4   : > { %710 = vrot.lane.b32.xlu1 %v2732_v30, %s2553_s15 }
 0x2a7   : > { %v707_v32 = vpop.permute.xlu1 %706 }
 0x2a8   : > { %712 = vrot.lane.b32.xlu1 %v2735_v31, %s2553_s15  ;;  %s2487_s15 = sshll.u32 %s2560_s24, 4  ;;  %s2488_s15 = int_to_ptr.vmem [resolvable:$false] %s2487_s15 }
 0x2a9   : > { %s2489_s2 = scalar_lea.vmem %s2488_s15, 256 }
 0x2ab   : > { %v555_v33 = vpop.permute.xlu1 %554 }
 0x2ac   : > { %557 = vrot.lane.b32.xlu1 %v552_v28, %s2552_s30  ;;  %v579_v56 = vcombine.low %v555_v33, %v561_v51  ;;  %v580_v57 = vcombine.high %v555_v33, %v561_v51  ;;  %s2098_s30 = scalar_lea.sflag [#allocation4], %s429_s23 }
 0x2ae   : > { %v587_v6 = vrot.slane %v579_v56, %v2738_v47  ;;  %v594_v7 = vrot.slane %v580_v57, %v2738_v47 }
 0x312   : > { %v709_v34 = vpop.permute.xlu1 %708 }
 0x316   : > { %v711_v40 = vpop.permute.xlu1 %710 }
 0x317   : > { %v718_v44 = vcombine.low %v707_v32, %v711_v40  ;;  %v719_v45 = vcombine.high %v707_v32, %v711_v40 }
 0x319   : > { %v726_v52 = vrot.slane %v718_v44, %v2738_v47  ;;  %v733_v53 = vrot.slane %v719_v45, %v2738_v47 }
 0x31a   : > { %v713_v46 = vpop.permute.xlu1 %712 }
 0x31b   : > { %v734_v48 = vcombine.low %v709_v34, %v713_v46  ;;  %v735_v49 = vcombine.high %v709_v34, %v713_v46 }
 0x31d   : > { %v742_v54 = vrot.slane %v734_v48, %v2738_v47  ;;  %v749_v55 = vrot.slane %v735_v49, %v2738_v47 }
 0x31e   : > { %v558_v58 = vpop.permute.xlu1 %557 }
 0x31f   : > { %v750_v59 = vcombine.low %v726_v52, %v742_v54  ;;  %v751_v60 = vcombine.high %v726_v52, %v742_v54  ;;  %v766_v61 = vcombine.low %v733_v53, %v749_v55  ;;  %v767_v62 = vcombine.high %v733_v53, %v749_v55 }
 0x320   : > { %v563_v63 = vcombine.low %v552_v28, %v558_v58  ;;  %v564_v1 = vcombine.high %v552_v28, %v558_v58 }
 0x321   : > { %v758_v2 = vrot.slane %v750_v59, %v2740_v50  ;;  %v765_v3 = vrot.slane %v751_v60, %v2740_v50  ;;  %v774_v4 = vrot.slane %v766_v61, %v2740_v50  ;;  %v781_v5 = vrot.slane %v767_v62, %v2740_v50 }
 0x322   : > { %v571_v8 = vrot.slane %v563_v63, %v2738_v47  ;;  %v578_v9 = vrot.slane %v564_v1, %v2738_v47 }
 0x323   : > { %v786_v11 = vcombine.low %v758_v2, %v765_v3  ;;  %v2182_v12 = vcombine.high %v758_v2, %v765_v3  ;;  %v802_v14 = vcombine.low %v774_v4, %v781_v5  ;;  %v2183_v15 = vcombine.high %v774_v4, %v781_v5 }
 0x324   : > { %v595_v16 = vcombine.low %v571_v8, %v587_v6  ;;  %v596_v17 = vcombine.high %v571_v8, %v587_v6  ;;  %v611_v18 = vcombine.low %v578_v9, %v594_v7  ;;  %v612_v19 = vcombine.high %v578_v9, %v594_v7 }
 0x325   : > { %v793_v20 = vrot.slane %v786_v11, %v2738_v47  ;;  %v801_v21 = vrot.slane %v2182_v12, %v2738_v47  ;;  %v809_v22 = vrot.slane %v802_v14, %v2738_v47  ;;  %v817_v23 = vrot.slane %v2183_v15, %v2738_v47 }
 0x326   : > { %v603_v24 = vrot.slane %v595_v16, %v2740_v50  ;;  %v610_v25 = vrot.slane %v596_v17, %v2740_v50  ;;  %v619_v27 = vrot.slane %v611_v18, %v2740_v50  ;;  %v626_v28 = vrot.slane %v612_v19, %v2740_v50 }
 0x327   : > { %v818_v32 = vcombine.low %v793_v20, %v801_v21  ;;  %v834_v33 = vcombine.low %v809_v22, %v817_v23  ;;  %v819_v34 = vcombine.high %v793_v20, %v801_v21  ;;  %v835_v35 = vcombine.high %v809_v22, %v817_v23 }
 0x328   : > { %v631_v36 = vcombine.low %v603_v24, %v610_v25  ;;  %v2180_v37 = vcombine.high %v603_v24, %v610_v25  ;;  %v647_v38 = vcombine.low %v619_v27, %v626_v28  ;;  %v2181_v39 = vcombine.high %v619_v27, %v626_v28 }
 0x329   : > { %v826_v40 = vrot.slane %v818_v32, %v2740_v50  ;;  %v842_v41 = vrot.slane %v834_v33, %v2740_v50  ;;  %v833_v42 = vrot.slane %v819_v34, %v2740_v50  ;;  %v849_v43 = vrot.slane %v835_v35, %v2740_v50 }
 0x32a   : > { %v638_v44 = vrot.slane %v631_v36, %v2738_v47  ;;  %v646_v45 = vrot.slane %v2180_v37, %v2738_v47  ;;  %v654_v46 = vrot.slane %v647_v38, %v2738_v47  ;;  %v662_v48 = vrot.slane %v2181_v39, %v2738_v47 }
 0x32b   : > { %v850_v49 = vcombine.low %v826_v40, %v842_v41  ;;  %v852_v51 = vcombine.low %v833_v42, %v849_v43  ;;  %v851_v62 = vcombine.high %v826_v40, %v842_v41  ;;  %v853_v1 = vcombine.high %v833_v42, %v849_v43 }
 0x32c   : > { %v663_v52 = vcombine.low %v638_v44, %v646_v45  ;;  %v679_v53 = vcombine.low %v654_v46, %v662_v48  ;;  %v664_v54 = vcombine.high %v638_v44, %v646_v45  ;;  %v680_v55 = vcombine.high %v654_v46, %v662_v48 }
 0x32d   : > { %2271 = vmatpush3.xpose.msk.msra.mxu1 %vm1002_vm2, %v850_v49  ;;  %2281 = vmatpush3.xpose.msk.msra.mxu0 %vm1002_vm2, %v852_v51 }
 0x32e   : > { %2275 = vmatprep.subr.mxu1 %v2549_v13  ;;  %v671_v56 = vrot.slane %v663_v52, %v2740_v50  ;;  %v687_v57 = vrot.slane %v679_v53, %v2740_v50  ;;  %v678_v58 = vrot.slane %v664_v54, %v2740_v50  ;;  %v694_v59 = vrot.slane %v680_v55, %v2740_v50 }
 0x32f   : > { %2290 = vmatprep.subr.mxu0 %v2549_v13 }
 0x330   : > { %v695_v60 = vcombine.low %v671_v56, %v687_v57  ;;  %v697_v61 = vcombine.low %v678_v58, %v694_v59  ;;  %v696_v63 = vcombine.high %v671_v56, %v687_v57  ;;  %v698_v2 = vcombine.high %v678_v58, %v694_v59 }
 0x332   : > { %2273 = vmatmul.mubr.msk.f32.vlgmr.msra.gmra.mrb[2].mxu1 %vm1002_vm2, %v695_v60  ;;  %2283 = vmatmul.mubr.msk.f32.vlgmr.msra.gmra.mrb[0].mxu0 %vm1002_vm2, %v697_v61 }
 0x333   : > { %2276 = vmatpush3.xpose.msk.msra.mxu1 %vm1002_vm2, %v851_v62  ;;  %2277 = vmatprep.mubr.msk.f32.mxu1 %vm2548_vm1, %v2549_v13 }
 0x334   : > { %2285 = vmatprep.subr.mxu1 %v2549_v13  ;;  %2292 = vmatprep.mubr.msk.f32.mxu0 %vm2548_vm1, %v2549_v13 }
 0x336   : > { %2278 = vmatmul.mubr.msk.f32.vlgmr.msra.gmra.mrb[4].mxu1 %vm1002_vm2, %v696_v63 }
 0x337   : > { %2286 = vmatpush3.xpose.msk.msra.mxu1 %vm1002_vm2, %v853_v1  ;;  %2287 = vmatprep.mubr.msk.f32.mxu1 %vm2548_vm1, %v2549_v13 }
 0x338   : > { %2295 = vmatprep.subr.mxu1 %v2549_v13 }
 0x33a   : > { %2288 = vmatmul.mubr.msk.f32.vlgmr.msra.gmra.mrb[6].mxu1 %vm1002_vm2, %v698_v2 }
 0x33b   : > { %2297 = vmatprep.mubr.msk.f32.mxu1 %vm2548_vm1, %v2549_v13 }
 0x405   : > { %v1075_v3 = vpop.f32.mrb[2].mxu1  ;;  %v1227_v4 = vpop.f32.mrb[0].mxu0 }
 0x406   : > { %v2274_v5 = vpop.f32.mrb[3].mxu1  ;;  %v2284_v6 = vpop.f32.mrb[1].mxu0  ;;  %v1307_v7 = vsel %vm1002_vm2, %v1075_v3, -inf  ;;  %v1313_v15 = vsel %vm1002_vm2, %v1227_v4, -inf }
 0x407   : > { %1308 = vmax.xlane.f32.xlu1 %v1307_v7 }
 0x409   : > { %v1151_v8 = vpop.f32.mrb[4].mxu1 }
 0x40a   : > { %v2279_v9 = vpop.f32.mrb[5].mxu1  ;;  %v1310_v11 = vsel %vm1002_vm2, %v1151_v8, -inf }
 0x40b   : > { %1311 = vmax.xlane.f32.xlu0 %v1310_v11 }
 0x40d   : > { %v1303_v12 = vpop.f32.mrb[6].mxu1 }
 0x40e   : > { %v2289_v14 = vpop.f32.mrb[7].mxu1  ;;  %v1316_v16 = vsel %vm1002_vm2, %v1303_v12, -inf }
 0x40f   : > { %1314 = vmax.xlane.f32.xlu0 %v1313_v15  ;;  %1317 = vmax.xlane.f32.xlu1 %v1316_v16 }
 0x420   : > { %856 = vrot.lane.b32.xlu1 %v2729_v29, %s2556_s16 }
 0x425   : > { %854 = vrot.lane.b32.xlu0 %v2722_v26, %s2556_s16 }
 0x494   : > { %v1309_v17 = vpop.xlane.xlu1 %1308 }
 0x495   : > { %v1319_v18 = vsub.f32 %v1075_v3, %v1309_v17 }
 0x497   : > { %v1323_v19 = vmul.f32 1.442695, %v1319_v18 }
 0x498   : > { %v1312_v20 = vpop.xlane.xlu0 %1311 }
 0x499   : > { %2463 = vpow2.f32 %v1323_v19  ;;  %v1320_v21 = vsub.f32 %v1151_v8, %v1312_v20 }
 0x49b   : > { %v1325_v22 = vmul.f32 1.442695, %v1320_v21 }
 0x49c   : > { %v1315_v23 = vpop.xlane.xlu0 %1314  ;;  %v1318_v24 = vpop.xlane.xlu1 %1317 }
 0x49d   : > { %2465 = vpow2.f32 %v1325_v22  ;;  %v1321_v25 = vsub.f32 %v1227_v4, %v1315_v23  ;;  %v1322_v27 = vsub.f32 %v1303_v12, %v1318_v24 }
 0x49f   : > { %v1327_v28 = vmul.f32 1.442695, %v1321_v25  ;;  %v1329_v32 = vmul.f32 1.442695, %v1322_v27 }
 0x4a0   : > { %v855_v39 = vpop.permute.xlu0 %854  ;;  %v857_v40 = vpop.permute.xlu1 %856 }
 0x4a1   : > { %2467 = vpow2.f32 %v1327_v28 }
 0x4a2   : > { %2469 = vpow2.f32 %v1329_v32 }
 0x4a3   : > { %v2802_v29 = vpop.eup %2463 }
 0x4a4   : > { %v1331_v26 = vsel %vm1002_vm2, %v2802_v29, 0.0 }
 0x4a5   : > { %1332 = vadd.xlane.f32.xlu0 %v1331_v26 }
 0x4a7   : > { %v2466_v33 = vpop.eup %2465 }
 0x4a8   : > { %v1334_v34 = vsel %vm1002_vm2, %v2466_v33, 0.0 }
 0x4a9   : > { %1335 = vadd.xlane.f32.xlu1 %v1334_v34 }
 0x4ab   : > { %v2807_v35 = vpop.eup %2467 }
 0x4ac   : > { %v2809_v36 = vpop.eup %2469  ;;  %v1337_v37 = vsel %vm1002_vm2, %v2807_v35, 0.0 }
 0x4ad   : > { %1338 = vadd.xlane.f32.xlu0 %v1337_v37  ;;  %v1340_v38 = vsel %vm1002_vm2, %v2809_v36, 0.0 }
 0x4ae   : > { %1341 = vadd.xlane.f32.xlu1 %v1340_v38 }
 0x4bf   : > { %858 = vrot.lane.b32.xlu1 %v2732_v30, %s2556_s16 }
 0x4c3   : > { %860 = vrot.lane.b32.xlu0 %v2735_v31, %s2556_s16  ;;  %s2111_s16 = sshll.u32 %s431_s1, 4  ;;  %s2988_s16 = int_to_ptr.vmem [resolvable:$true] %s2111_s16 }
 0x4c4   : > { %s2483_s29 = scalar_lea.vmem %s2988_s16, 128  ;;  %p2490_p0 = scmp.lt.s32.totalorder %s2988_s16, %s2488_s15 }
 0x4c5   : > { %p2484_p11 = scmp.ne.s32.totalorder %s2988_s16, %s2483_s29  ;;  %p2491_p1 = scmp.lt.s32.totalorder %s2489_s2, %s2483_s29 }
 0x4c7   : > { %p2485_p12 = pnand %p2484_p11, %p2669_p5  ;;  %p2492_p2 = por %p2491_p1, %p2490_p0 }
 0x4c9   : > { %p2486_p13 = pneg %p2485_p12 }
 0x4cb   : > { %p2493_p3 = pnand %p2492_p2, %p2486_p13 }
 0x532   : > { %v1333_v41 = vpop.xlane.xlu0 %1332 }
 0x533   : > { %2471 = vrcp.f32 %v1333_v41 }
 0x536   : > { %v1336_v42 = vpop.xlane.xlu1 %1335 }
 0x537   : > { %2473 = vrcp.f32 %v1336_v42 }
 0x53a   : > { %v1339_v43 = vpop.xlane.xlu0 %1338 }
 0x53b   : > { %v1342_v44 = vpop.xlane.xlu1 %1341  ;;  %2475 = vrcp.f32 %v1339_v43 }
 0x53c   : > { %2477 = vrcp.f32 %v1342_v44 }
 0x53d   : > { %v2472_v11 = vpop.eup %2471 }
 0x53e   : > { %v861_v45 = vpop.permute.xlu0 %860  ;;  %v1344_v23 = vmul.f32 %v2472_v11, %v2802_v29  ;;  %v1796_v29 = vld [vmem:[%s3034_s5] sm:$0xff] }
 0x53f   : > { %v882_v46 = vcombine.low %v857_v40, %v861_v45  ;;  %v883_v48 = vcombine.high %v857_v40, %v861_v45  ;;  %v859_v49 = vpop.permute.xlu1 %858 }
 0x540   : > { %v866_v51 = vcombine.low %v855_v39, %v859_v49  ;;  %v867_v52 = vcombine.high %v855_v39, %v859_v49 }
 0x541   : > { %v890_v53 = vrot.slane %v882_v46, %v2738_v47  ;;  %v897_v54 = vrot.slane %v883_v48, %v2738_v47  ;;  %v2474_v16 = vpop.eup %2473 }
 0x542   : > { %v874_v30 = vrot.slane %v866_v51, %v2738_v47  ;;  %v881_v31 = vrot.slane %v867_v52, %v2738_v47  ;;  %v1346_v24 = vmul.f32 %v2474_v16, %v2466_v33  ;;  %v1797_v33 = vld [vmem:[%s3034_s5 + $0x8] sm:$0xff] }
 0x543   : > { %v2374_v34 = vpack.c.bf16 %v1797_v33, %v1796_v29 }
 0x544   : > { %v898_v55 = vcombine.low %v874_v30, %v890_v53  ;;  %v899_v56 = vcombine.high %v874_v30, %v890_v53  ;;  %v914_v57 = vcombine.low %v881_v31, %v897_v54  ;;  %v915_v58 = vcombine.high %v881_v31, %v897_v54 }
 0x545   : > { %v2476_v22 = vpop.eup %2475 }
 0x546   : > { %v906_v59 = vrot.slane %v898_v55, %v2740_v50  ;;  %v913_v60 = vrot.slane %v899_v56, %v2740_v50  ;;  %v922_v61 = vrot.slane %v914_v57, %v2740_v50  ;;  %v929_v62 = vrot.slane %v915_v58, %v2740_v50  ;;  %v2478_v25 = vpop.eup %2477  ;;  %v1798_v55 = vld [vmem:[%s3034_s5 + $0x10] sm:$0xff]  ;;  %v1799_v56 = vld [vmem:[%s3034_s5 + $0x18] sm:$0xff] }
 0x547   : > { %v1348_v32 = vmul.f32 %v2476_v22, %v2807_v35  ;;  %v1350_v26 = vmul.f32 %v2478_v25, %v2809_v36 }
 0x548   : > { %v934_v63 = vcombine.low %v906_v59, %v913_v60  ;;  %v2184_v1 = vcombine.high %v906_v59, %v913_v60  ;;  %v950_v2 = vcombine.low %v922_v61, %v929_v62  ;;  %v2185_v3 = vcombine.high %v922_v61, %v929_v62 }
 0x549   : > { %v2377_v61 = vpack.c.bf16 %v1799_v56, %v1798_v55  ;;  %v2202_v56 = vld [vmem:[%s3036_s7] ss:$0 sm:$0xff] }
 0x54a   : > { %v941_v4 = vrot.slane %v934_v63, %v2738_v47  ;;  %v949_v5 = vrot.slane %v2184_v1, %v2738_v47  ;;  %v957_v6 = vrot.slane %v950_v2, %v2738_v47  ;;  %v965_v7 = vrot.slane %v2185_v3, %v2738_v47 }
 0x54c   : > { %v966_v8 = vcombine.low %v941_v4, %v949_v5  ;;  %v967_v9 = vcombine.high %v941_v4, %v949_v5  ;;  %v982_v12 = vcombine.low %v957_v6, %v965_v7  ;;  %v983_v14 = vcombine.high %v957_v6, %v965_v7 }
 0x54e   : > { %v974_v15 = vrot.slane %v966_v8, %v2740_v50  ;;  %v990_v17 = vrot.slane %v982_v12, %v2740_v50  ;;  %v981_v18 = vrot.slane %v967_v9, %v2740_v50  ;;  %v997_v19 = vrot.slane %v983_v14, %v2740_v50 }
 0x550   : > { %v998_v20 = vcombine.low %v974_v15, %v990_v17  ;;  %v999_v21 = vcombine.high %v974_v15, %v990_v17  ;;  %v1000_v27 = vcombine.low %v981_v18, %v997_v19  ;;  %v1001_v28 = vcombine.high %v981_v18, %v997_v19 }
 0x552   : > { %2291 = vmatpush3.msra.mxu0 %v998_v20  ;;  %2296 = vmatpush3.msra.mxu1 %v999_v21 }
 0x553   : > { %2293 = vmatmul.mubr.msk.f32.vlgmr.msra.gmra.mrb[2].mxu0 %vm1002_vm2, %v1344_v23  ;;  %2298 = vmatmul.mubr.msk.f32.vlgmr.msra.gmra.mrb[8].mxu1 %vm1002_vm2, %v1346_v24 }
 0x554   : > { %2300 = vmatprep.subr.mxu0 %v2549_v13  ;;  %2305 = vmatprep.subr.mxu1 %v2549_v13 }
 0x555   : > { %2301 = vmatpush3.msra.mxu0 %v1000_v27  ;;  %2306 = vmatpush3.msra.mxu1 %v1001_v28  ;;  %v2201_v28 = vld [vmem:[%s3035_s6] ss:$0 sm:$0xff] }
 0x556   : > { %2302 = vmatprep.mubr.msk.f32.mxu0 %vm2548_vm1, %v2549_v13  ;;  %2307 = vmatprep.mubr.msk.f32.mxu1 %vm2548_vm1, %v2549_v13 }
 0x557   : > { %2303 = vmatmul.mubr.msk.f32.vlgmr.msra.gmra.mrb[4].mxu0 %vm1002_vm2, %v1348_v32  ;;  %2308 = vmatmul.mubr.msk.f32.vlgmr.msra.gmra.mrb[10].mxu1 %vm1002_vm2, %v1350_v26 }
 0x558   : > { %2373 = vmatprep.subr.bf16.mxu1 %v2547_v10  ;;  %2318 = vmatprep.mubr.msk.f32.mxu1 %vm2548_vm1, %v2549_v13 }
 0x559   : > { %2385 = vmatprep.subr.bf16.mxu0 %v2547_v10  ;;  %2364 = vmatprep.mubr.msk.f32.mxu0 %vm2548_vm1, %v2549_v13 }
 0x55a   : > { %2375 = vmatpush3.bf16.msra.mxu1 %v2374_v34 }
 0x55b   : > { %2376 = vmatprep.subr.bf16.mxu1 %v2547_v10 }
 0x55e   : > { %2378 = vmatpush3.bf16.msra.mxu1 %v2377_v61  ;;  %v2008_v61 = vld [vmem:[%s3040_s11 + $0x30] sm:$0xff] }
 0x55f   : > { %2379 = vmatprep.subr.bf16.mxu1 %v2547_v10 }
 0x626   : > { %v1420_v35 = vpop.f32.mrb[2].mxu0  ;;  %v1493_v36 = vpop.f32.mrb[8].mxu1 }
 0x627   : > { %v2294_v37 = vpop.f32.mrb[3].mxu0  ;;  %v2299_v38 = vpop.f32.mrb[9].mxu1 }
 0x628   : > { %v1913_v38 = vld [vmem:[%s3038_s9] sm:$0xff] }
 0x62a   : > { %v1566_v39 = vpop.f32.mrb[4].mxu0  ;;  %v1639_v40 = vpop.f32.mrb[10].mxu1 }
 0x62b   : > { %v1643_v41 = vcombine.low %v1420_v35, %v1566_v39  ;;  %v1644_v42 = vcombine.high %v1420_v35, %v1566_v39  ;;  %v1659_v43 = vcombine.low %v1493_v36, %v1639_v40  ;;  %v1660_v44 = vcombine.high %v1493_v36, %v1639_v40  ;;  %v2304_v45 = vpop.f32.mrb[5].mxu0  ;;  %v2309_v46 = vpop.f32.mrb[11].mxu1  ;;  %v1915_v40 = vld [vmem:[%s3038_s9 + $0x10] sm:$0xff] }
 0x62c   : > { %v2004_v45 = vld [vmem:[%s3040_s11 + $0x10] sm:$0xff] }
 0x62d   : > { %v1651_v48 = vrot.slane %v1643_v41, %v2738_v47  ;;  %v1658_v49 = vrot.slane %v1644_v42, %v2738_v47  ;;  %v1667_v51 = vrot.slane %v1659_v43, %v2738_v47  ;;  %v1674_v52 = vrot.slane %v1660_v44, %v2738_v47  ;;  %v1916_v41 = vld [vmem:[%s3038_s9 + $0x18] sm:$0xff]  ;;  %v2002_v43 = vld [vmem:[%s3040_s11] sm:$0xff]  ;;  %v2003_v44 = vld [vmem:[%s3040_s11 + $0x8] sm:$0xff] }
 0x62e   : > { %v2383_v42 = vpack.c.bf16 %v1916_v41, %v1915_v40  ;;  %v2386_v46 = vpack.c.bf16 %v2003_v44, %v2002_v43 }
 0x62f   : > { %v1675_v53 = vcombine.low %v1651_v48, %v1667_v51  ;;  %v1676_v54 = vcombine.high %v1651_v48, %v1667_v51  ;;  %v1691_v30 = vcombine.low %v1658_v49, %v1674_v52  ;;  %v1692_v31 = vcombine.high %v1658_v49, %v1674_v52  ;;  %v2005_v48 = vld [vmem:[%s3040_s11 + $0x18] sm:$0xff]  ;;  %v2006_v51 = vld [vmem:[%s3040_s11 + $0x20] sm:$0xff]  ;;  %v2007_v52 = vld [vmem:[%s3040_s11 + $0x28] sm:$0xff] }
 0x630   : > { %2387 = vmatpush3.bf16.msra.mxu0 %v2386_v46  ;;  %v2389_v49 = vpack.c.bf16 %v2005_v48, %v2004_v45 }
 0x631   : > { %v1683_v57 = vrot.slane %v1675_v53, %v2740_v50  ;;  %v1690_v58 = vrot.slane %v1676_v54, %v2740_v50  ;;  %v1699_v59 = vrot.slane %v1691_v30, %v2740_v50  ;;  %v1706_v60 = vrot.slane %v1692_v31, %v2740_v50  ;;  %2388 = vmatprep.subr.bf16.mxu0 %v2547_v10 }
 0x632   : > { %v2392_v53 = vpack.c.bf16 %v2007_v52, %v2006_v51 }
 0x633   : > { %v1711_v62 = vcombine.low %v1683_v57, %v1690_v58  ;;  %v2198_v63 = vcombine.high %v1683_v57, %v1690_v58  ;;  %v1727_v1 = vcombine.low %v1699_v59, %v1706_v60  ;;  %v2199_v2 = vcombine.high %v1699_v59, %v1706_v60  ;;  %v2203_v58 = vld [vmem:[%s3037_s8] ss:$0 sm:$0xff] }
 0x634   : > { %2390 = vmatpush3.bf16.msra.mxu0 %v2389_v49 }
 0x635   : > { %v1718_v3 = vrot.slane %v1711_v62, %v2738_v47  ;;  %v1726_v4 = vrot.slane %v2198_v63, %v2738_v47  ;;  %v1734_v5 = vrot.slane %v1727_v1, %v2738_v47  ;;  %v1742_v6 = vrot.slane %v2199_v2, %v2738_v47  ;;  %2391 = vmatprep.subr.bf16.mxu0 %v2547_v10  ;;  %v2009_v62 = vld [vmem:[%s3040_s11 + $0x38] sm:$0xff]  ;;  %v2010_v1 = vld [vmem:[%s3040_s11 + $0x40] sm:$0xff]  ;;  %v2011_v2 = vld [vmem:[%s3040_s11 + $0x48] sm:$0xff] }
 0x636   : > { %v2395_v63 = vpack.c.bf16 %v2009_v62, %v2008_v61 }
 0x637   : > { %v1744_v7 = vcombine.high %v1718_v3, %v1726_v4  ;;  %v1760_v8 = vcombine.high %v1734_v5, %v1742_v6  ;;  %v1743_v9 = vcombine.low %v1718_v3, %v1726_v4  ;;  %v1759_v11 = vcombine.low %v1734_v5, %v1742_v6  ;;  %v2012_v4 = vld [vmem:[%s3040_s11 + $0x50] sm:$0xff]  ;;  %v2013_v5 = vld [vmem:[%s3040_s11 + $0x58] sm:$0xff] }
 0x638   : > { %2393 = vmatpush3.bf16.msra.mxu0 %v2392_v53  ;;  %v2398_v3 = vpack.c.bf16 %v2011_v2, %v2010_v1  ;;  %v2401_v6 = vpack.c.bf16 %v2013_v5, %v2012_v4 }
 0x639   : > { %v1758_v12 = vrot.slane %v1744_v7, %v2740_v50  ;;  %v1774_v14 = vrot.slane %v1760_v8, %v2740_v50  ;;  %v1751_v15 = vrot.slane %v1743_v9, %v2740_v50  ;;  %v1767_v16 = vrot.slane %v1759_v11, %v2740_v50  ;;  %2394 = vmatprep.subr.bf16.mxu0 %v2547_v10  ;;  %v2014_v7 = vld [vmem:[%s3040_s11 + $0x60] sm:$0xff]  ;;  %v2015_v8 = vld [vmem:[%s3040_s11 + $0x68] sm:$0xff]  ;;  %v2016_v11 = vld [vmem:[%s3040_s11 + $0x70] sm:$0xff] }
 0x63a   : > { %v2404_v9 = vpack.c.bf16 %v2015_v8, %v2014_v7 }
 0x63b   : > { %v1777_v17 = vcombine.low %v1758_v12, %v1774_v14  ;;  %v1776_v18 = vcombine.high %v1751_v15, %v1767_v16  ;;  %v1778_v19 = vcombine.high %v1758_v12, %v1774_v14  ;;  %v1775_v20 = vcombine.low %v1751_v15, %v1767_v16  ;;  %v2017_v12 = vld [vmem:[%s3040_s11 + $0x78] sm:$0xff]  ;;  %v2204_v15 = vld [vmem:[%s3039_s10] ss:$0 sm:$0xff] }
 0x63c   : > { %2396 = vmatpush3.bf16.msra.mxu0 %v2395_v63  ;;  %v2407_v14 = vpack.c.bf16 %v2017_v12, %v2016_v11 }
 0x63d   : > { %1784 = vrot.lane.b32.xlu0 %v1777_v17, %s2557_s20  ;;  %1780 = vrot.lane.b32.xlu1 %v1776_v18, %s2558_s21 }
 0x63e   : > { %2397 = vmatprep.subr.bf16.mxu0 %v2547_v10 }
 0x640   : > { %2399 = vmatpush3.bf16.msra.mxu0 %v2398_v3 }
 0x641   : > { %1788 = vrot.lane.b32.xlu1 %v1778_v19, %s2559_s22  ;;  %2400 = vmatprep.subr.bf16.mxu0 %v2547_v10  ;;  %s2986_s22 = scalar_lea.hbm %s3042_s13, %s2208_s0 }
 0x644   : > { %2402 = vmatpush3.bf16.msra.mxu0 %v2401_v6 }
 0x645   : > { %2403 = vmatprep.subr.bf16.mxu0 %v2547_v10 }
 0x648   : > { %2405 = vmatpush3.bf16.msra.mxu0 %v2404_v9 }
 0x649   : > { %2406 = vmatprep.subr.bf16.mxu0 %v2547_v10 }
 0x64c   : > { %2408 = vmatpush3.bf16.msra.mxu0 %v2407_v14 }
 0x6af   : > { %v1781_v47 = vpop.permute.xlu1 %1780  ;;  %v1785_v21 = vpop.permute.xlu0 %1784 }
 0x6b0   : > { %v1791_v22 = vsel %vm1002_vm2, %v1775_v20, %v1781_v47 }
 0x6b1   : > { %v1793_v24 = vsel %vm1792_vm3, %v1791_v22, %v1785_v21  ;;  %v2206_v22 = vld [vmem:[%s3041_s12] ss:$0 sm:$0xff] }
 0x6b3   : > { %v1789_v23 = vpop.permute.xlu1 %1788 }
 0x6b4   : > { %v1795_v25 = vsel %vm1794_vm4, %v1793_v24, %v1789_v23 }
 0x6b5   : > { %2319 = vmatmul.mubr.msk.f32.vlgmr.msra.gmra.mrb[12].mxu1 %vm439_vm0, %v1795_v25 }
 0x6b6   : > { %2329 = vmatprep.mubr.msk.f32.mxu1 %vm2548_vm1, %v2549_v13 }
 0x788   : > { %v1869_v50 = vpop.f32.mrb[12].mxu1 }
 0x789   : > { %1873 = vst.msk [vmem:[#allocation2] sm:$0xff] %vm439_vm0, %v1869_v50  ;;  %v2320_v27 = vpop.f32.mrb[13].mxu1 }
 0x790   : > { %v1874_v32 = vld [vmem:[#allocation2] sm:$0xff] }
 0x791   : > { %v1882_v26 = vadd.f32 %v2201_v28, %v1874_v32 }
 0x793   : > { %v2893_v29 = vadd.f32 %v1882_v26, %v2684_v0  ;;  %v1914_v0 = vld [vmem:[%s3038_s9 + $0x8] sm:$0xff] }
 0x794   : > { %v2380_v39 = vpack.c.bf16 %v1914_v0, %v1913_v38 }
 0x795   : > { %v1886_v33 = vsel %vm439_vm0, %v2893_v29, 0.0 }
 0x796   : > { %1887 = vadd.xlane.f32.xlu0 %v1886_v33  ;;  %2381 = vmatpush3.bf16.msra.mxu1 %v2380_v39 }
 0x797   : > { %2382 = vmatprep.subr.bf16.mxu1 %v2547_v10 }
 0x79a   : > { %2384 = vmatpush3.bf16.msra.mxu1 %v2383_v42 }
 0x823   : > { %v1888_v34 = vpop.xlane.xlu0 %1887 }
 0x824   : > { %v1889_v35 = vmul.f32 0.03125, %v1888_v34 }
 0x826   : > { %v1890_v13 = vsub.f32 %v2893_v29, %v1889_v35 }
 0x828   : > { %v1891_v36 = vmul.f32 %v1890_v13, %v1890_v13 }
 0x82a   : > { %v1892_v37 = vsel %vm439_vm0, %v1891_v36, 0.0 }
 0x82b   : > { %1893 = vadd.xlane.f32.xlu1 %v1892_v37 }
 0x8b8   : > { %v1894_v54 = vpop.xlane.xlu1 %1893 }
 0x8b9   : > { %v1895_v30 = vmul.f32 0.03125, %v1894_v54 }
 0x8bb   : > { %v1896_v31 = vadd.f32 1e-05, %v1895_v30 }
 0x8bd   : > { %2479 = vrsqrt.f32 %v1896_v31 }
 0x8c7   : > { %v2480_v55 = vpop.eup %2479 }
 0x8c8   : > { %v1898_v57 = vmul.f32 %v2480_v55, %v1890_v13 }
 0x8ca   : > { %v1905_v59 = vmul.f32 %v2202_v56, %v1898_v57 }
 0x8cc   : > { %v1912_v60 = vadd.f32 %v2203_v58, %v1905_v59 }
 0x8ce   : > { %2330 = vmatmul.mubr.msk.f32.vlgmr.msra.gmra.mrb[14].mxu1 %vm439_vm0, %v1912_v60 }
 0x9a1   : > { %v1993_v16 = vpop.f32.mrb[14].mxu1 }
 0x9a2   : > { %v1994_v17 = vadd.f32 %v2204_v15, %v1993_v16  ;;  %v2331_v18 = vpop.f32.mrb[15].mxu1 }
 0x9a4   : > { %v1998_v10 = vmul.f32 0.70710677, %v1994_v17  ;;  %v1997_v20 = vmul.f32 0.5, %v1994_v17 }
 0x9a6   : > { %2481 = verf.f32 %v1998_v10 }
 0x9b0   : > { %v2482_v19 = vpop.eup %2481 }
 0x9b1   : > { %v2000_v47 = vadd.f32 1.0, %v2482_v19 }
 0x9b3   : > { %v2001_v21 = vmul.f32 %v2000_v47, %v1997_v20 }
 0x9b5   : > { %2365 = vmatmul.mubr.f32.vlgmr.msra.gmra.mrb[6].mxu0 %v2001_v21 }
 0xa88   : > { %v2091_v23 = vpop.f32.mrb[6].mxu0 }
 0xa89   : > { %v2092_v24 = vadd.f32 %v2206_v22, %v2091_v23  ;;  %v2366_v25 = vpop.f32.mrb[7].mxu0 }
 0xa8b   : > { %v2095_v50 = vadd.f32 %v2092_v24, %v2893_v29 }
 0xa8d   : > { %2096 = vst.msk [vmem:[%s431_s1] sm:$0xff] %vm439_vm0, %v2095_v50 }
 0xa8e   : > { %2496 = shalt.err (!%p2493_p3)
}
 0xa8f   : > { %s2497_s23 = scalar_lea.hbm %s2986_s22, 128  ;;  %s2501_s20 = scalar_lea.hbm %s3042_s13, 256 }
 0xa90   : > { %p2498_p4 = scmp.ne.s32.totalorder %s2986_s22, %s2497_s23  ;;  %p2502_p9 = scmp.lt.u32.totalorder %s2986_s22, %s3042_s13 }
 0xa91   : > { %p2503_p10 = scmp.lt.u32.totalorder %s2501_s20, %s2497_s23  ;;  %p2505_p12 = scmp.lt.u32.totalorder %s2497_s23, %s2986_s22 }
 0xa92   : > { %p2499_p7 = pnand %p2498_p4, %p2669_p5 }
 0xa93   : > { %p2504_p11 = por %p2503_p10, %p2502_p9 }
 0xa94   : > { %p2500_p8 = pneg %p2499_p7 }
 0xa95   : > { %p2506_p13 = por %p2505_p12, %p2504_p11 }
 0xa97   : > { %p2507_p0 = pnand %p2506_p13, %p2500_p8 }
 0xa99   : > { %2510 = shalt.err (!%p2507_p0)
}
 0xa9a   : > { %2409 = dma.vmem_to_hbm [thread:$0]  (%p2669_p5), %s2988_s16, 128, %s2986_s22, %s2098_s30  }
 0xa9b PF: > { %p2415_p1 = scmp.ge.s32.totalorder %s2545_s28, 2  ;;  %s2123_s2 = sand.u32 1, %s2533_s25  }
 0xa9c   : > { %s2124_s29 = scalar_lea.sflag [#allocation4], %s2123_s2 }
 0xa9d   : > { %p2412_p2 = pnand %p2415_p1, %p2673_p6 }
 0xa9f   : > { %2528 = dma.done.wait (!%p2412_p2), %s2124_s29, 128  }
 0xaa0   : > { %2530 = vsyncadd (!%p2412_p2), %s2124_s29, 4294967168  ;;  %p23_p3 = scmp.ge.s32.totalorder %s2656_s14, 4   ;;  %s3051_s25 = smov %s2537_s26 }
 0xaa1   : > { %s3052_s26 = smov %s2541_s27  ;;  %s3053_s27 = smov %s2667_s17 }
 0xaa2   : > { %s3054_s28 = smov %s2656_s14  ;;  %25 = sbr.rel (!%p23_p3) target bundleno = 7 (0x7), region = 107 }
 0xaa9   :  { %2129 = vsyncpa [#allocation4], 1 }
 0xaaa   :  { %2131 = vsyncpa [#allocation4 + $0x1], 1 }

</bundles_post_ra>
